<compile_context>
chip_gen: v7x
topology: tpu7x:2x2x1
jax: 0.10.0
libtpu: 0.0.40
codegen_flags: <defaults>
</compile_context>

<pallas_src>
import jax
import jax.numpy as jnp
from jax import lax
from jax.experimental import pallas as pl
from jax.experimental.pallas import tpu as pltpu


_LANE = 128
_MAX_TILE_C = 4096          # cap on lanes per block (elements)
_SLAB_BYTES = 1 << 20       # target f32 working-set per inner strip-mine pass


def _round_up(x: int, m: int) -> int:
    return ((x + m - 1) // m) * m


def _round_down(x: int, m: int) -> int:
    return (x // m) * m


def _sublane_pack(itemsize: int) -> int:
    # native sublane packing of the input dtype: 8 (4B), 16 (2B), 32 (1B)
    return max(8, 32 // max(1, itemsize))


def _per_input_block_budget():
    """(bytes of input per block, scoped-VMEM limit) — generation aware."""
    try:
        info = pltpu.get_tpu_info()
        vmem = int(getattr(info, "vmem_capacity_bytes", 0) or 0)
        if vmem >= 96 * 1024 * 1024:
            # v5e / v6e: 128 MiB physical VMEM -> fat 8 MiB-per-input blocks.
            return 8 * 1024 * 1024, 48 * 1024 * 1024
    except Exception:
        pass
    # v7x (64 MiB VMEM) or unknown chip: stay conservative but still >=4 MiB.
    return 4 * 1024 * 1024, 40 * 1024 * 1024


def _choose_tiles(R: int, C: int, itemsize: int):
    pack = _sublane_pack(itemsize)
    block_budget, vmem_limit = _per_input_block_budget()

    # Column (lane) tile: a multiple of 128 that never exceeds C, or the full
    # (legal) dim when C < 128.  Ragged last blocks are masked in-kernel.
    if C < _LANE:
        tile_c = C
    else:
        tile_c = min(_MAX_TILE_C, _round_down(C, _LANE))

    # Row (sublane) tile from the per-input byte budget.
    if R < pack:
        tile_r = R                                    # full-dim block (legal)
    else:
        rows_budget = max(pack, _round_down(block_budget // (tile_c * itemsize), pack))
        tile_r = min(_round_down(R, pack), rows_budget)
        if R >= 2 * pack:
            # Keep >= 2 row tiles so both v7x TensorCores stream (the row axis
            # is the only megacore-parallel axis).
            tile_r = min(tile_r, _round_up((R + 1) // 2, pack))
        tile_r = max(pack, tile_r)

    # Inner strip-mining slab: bounds f32 temporaries regardless of block size.
    slab_r = max(pack, _round_down(_SLAB_BYTES // (tile_c * 4), pack))
    slab_r = min(slab_r, tile_r)

    return tile_r, tile_c, slab_r, vmem_limit


def _build_sse_call(R, C, tile_r, tile_c, slab_r, vmem_limit, scale):
    grid_r = pl.cdiv(R, tile_r)
    grid_c = pl.cdiv(C, tile_c)
    row_ragged = (R % tile_r) != 0
    col_ragged = (C % tile_c) != 0
    n_full = tile_r // slab_r
    rem = tile_r - n_full * slab_r
    sub = 8 if tile_r % 8 == 0 else 1            # sublane extent of accumulator
    out_lane = tile_c if tile_c < _LANE else _LANE

    def kernel(pred_ref, gt_ref, out_ref):
        i = pl.program_id(0)
        j = pl.program_id(1)

        @pl.when(j == 0)
        def _init():
            out_ref[...] = jnp.zeros_like(out_ref)

        def slab_partial(r0, nrows):
            # widen -> diff -> (mask) -> square on one row slab of the block
            p = pred_ref[pl.ds(r0, nrows), :].astype(jnp.float32)
            g = gt_ref[pl.ds(r0, nrows), :].astype(jnp.float32)
            d = p - g
            if row_ragged or col_ragged:
                valid = None
                if row_ragged:
                    rows = lax.broadcasted_iota(jnp.int32, (nrows, tile_c), 0)
                    valid = (i * tile_r + r0 + rows) < R
                if col_ragged:
                    cols = lax.broadcasted_iota(jnp.int32, (nrows, tile_c), 1)
                    vc = (j * tile_c + cols) < C
                    valid = vc if valid is None else jnp.logical_and(valid, vc)
                d = jnp.where(valid, d, 0.0)
            sq = d * d
            if sub == 8:
                # (nrows, tile_c) -> (8, tile_c): sublane-aligned leading split
                # + elementwise VALU adds (no cross-lane traffic in hot loop).
                return sq.reshape(nrows // 8, 8, tile_c).sum(axis=0)
            return jnp.sum(sq, axis=0, keepdims=True)   # tiny-R fallback

        if n_full == 1 and rem == 0:
            slab_sum = slab_partial(0, tile_r)
        else:
            def body(s, carry):
                r0 = pl.multiple_of(s * slab_r, slab_r)
                return carry + slab_partial(r0, slab_r)
            slab_sum = lax.fori_loop(0, n_full, body,
                                     jnp.zeros((sub, tile_c), jnp.float32))
            if rem > 0:
                slab_sum = slab_sum + slab_partial(n_full * slab_r, rem)

        # Lane fold: (sub, tile_c) -> (sub, out_lane) via 128-aligned static
        # slices (picks one vreg column per chunk; no relayout).
        if tile_c == out_lane:
            folded = slab_sum
        else:
            folded = slab_sum[:, :_LANE]
            for k in range(1, tile_c // _LANE):
                folded = folded + slab_sum[:, k * _LANE:(k + 1) * _LANE]

        out_ref[...] = out_ref[...] + folded[None]

        @pl.when(j == grid_c - 1)
        def _finalize():
            # per-row-tile partial already carries the 0.5 / numel scale
            out_ref[...] = out_ref[...] * scale

    return pl.pallas_call(
        kernel,
        out_shape=jax.ShapeDtypeStruct((grid_r, sub, out_lane), jnp.float32),
        grid=(grid_r, grid_c),
        in_specs=[
            pl.BlockSpec((tile_r, tile_c), lambda i, j: (i, j)),
            pl.BlockSpec((tile_r, tile_c), lambda i, j: (i, j)),
        ],
        out_specs=pl.BlockSpec((1, sub, out_lane), lambda i, j: (i, 0, 0)),
        compiler_params=pltpu.CompilerParams(
            dimension_semantics=("parallel", "arbitrary"),
            vmem_limit_bytes=vmem_limit,
        ),
    )


def _joints_mse(pred_2d, gt_2d, numel):
    R, C = pred_2d.shape
    itemsize = jnp.dtype(pred_2d.dtype).itemsize
    tile_r, tile_c, slab_r, vmem_limit = _choose_tiles(R, C, itemsize)
    scale = 0.5 / float(numel)
    call = _build_sse_call(R, C, tile_r, tile_c, slab_r, vmem_limit, scale)
    partials = call(pred_2d, gt_2d)          # (grid_r, sub, out_lane), pre-scaled
    return jnp.sum(partials, dtype=jnp.float32).reshape(1)


class JointsMSELoss:
    """JAX/Pallas port of the PyTorch JointsMSELoss module."""

    def __init__(self, **loss_params):
        self.scaled_loss = loss_params.get("scaled_loss")
        if not isinstance(self.scaled_loss, bool):
            raise KeyError(f"scaled_loss: {self.scaled_loss} must be a boolean.")
        # scaled_loss is validated but unused in forward, matching the reference.

    def __call__(self, output, target):
        # output: (B, J, H, W) jnp array (NCHW)
        # target: list of length B of dicts with key 'heatmap' -> (J, H, W)
        if output.shape[0] != len(target):
            raise ValueError(
                f"the number of prediction ({output.shape[0]}) and the number of "
                f"targets ({len(target)} are not the same)"
            )
        batch_size, num_joints = output.shape[0], output.shape[1]
        # Host-side glue mirroring the torch `heatmaps_gt[i] = t['heatmap']`
        # loop, including the cast to the prediction dtype.
        heatmaps_gt = jnp.stack([t["heatmap"] for t in target], axis=0).astype(
            output.dtype
        )

        R = batch_size * num_joints
        pred_2d = output.reshape(R, -1)       # row-major flat view, no transpose
        gt_2d = heatmaps_gt.reshape(R, -1)

        loss = _joints_mse(pred_2d, gt_2d, output.size)
        return {"joint_mse_loss": loss}


def _reference_loss(output, gt):
    # plain-JAX mirror of the PyTorch per-joint loop
    J = output.shape[1]
    ref = 0.0
    for j in range(J):
        p = output[:, j].reshape(-1)
        g = gt[:, j].reshape(-1)
        ref = ref + 0.5 * jnp.mean((p - g) ** 2)
    return ref / J


if __name__ == "__main__":
    loss_fn = JointsMSELoss(scaled_loss=False)
    key = jax.random.PRNGKey(0)
    k1, k2, k3, k4 = jax.random.split(key, 4)

    # --- aligned shapes (single-block fast path) ---
    B, J, H, W = 2, 4, 16, 16
    output = jax.random.normal(k1, (B, J, H, W), dtype=jnp.float32)
    gt = jax.random.uniform(k2, (B, J, H, W), dtype=jnp.float32)
    target = [{"heatmap": gt[i]} for i in range(B)]
    loss = jax.block_until_ready(loss_fn(output, target)["joint_mse_loss"])
    ref = _reference_loss(output, gt)
    assert jnp.allclose(loss[0], ref, rtol=1e-5, atol=1e-6), (loss, ref)

    # --- ragged shapes (exercises in-kernel row/col masking, no pad copies) ---
    B2, J2, H2, W2 = 3, 5, 12, 11
    out2 = jax.random.normal(k3, (B2, J2, H2, W2), dtype=jnp.float32)
    gt2 = jax.random.uniform(k4, (B2, J2, H2, W2), dtype=jnp.float32)
    target2 = [{"heatmap": gt2[i]} for i in range(B2)]
    loss2 = jax.block_until_ready(loss_fn(out2, target2)["joint_mse_loss"])
    ref2 = _reference_loss(out2, gt2)
    assert jnp.allclose(loss2[0], ref2, rtol=1e-5, atol=1e-6), (loss2, ref2)

    print("KERNEL_OK")
</pallas_src>

<mosaic_0001>
module attributes {stable_mosaic.version = 11 : i64} {
  func.func @kernel(%arg0: i32, %arg1: i32, %arg2: memref<8x256xf32, #tpu.memory_space<vmem>>, %arg3: memref<8x256xf32, #tpu.memory_space<vmem>>, %arg4: memref<1x8x128xf32, #tpu.memory_space<vmem>>) attributes {dimension_semantics = [#tpu.dimension_semantics<parallel>, #tpu.dimension_semantics<arbitrary>], iteration_bounds = array<i64: 1, 1>, scalar_prefetch = 0 : i64, scratch_operands = 0 : i64, tpu.core_type = #tpu.core_type<tc>, window_params = [{transform_indices = @transform_0, window_bounds = array<i64: 8, 256>}, {transform_indices = @transform_1, window_bounds = array<i64: 8, 256>}, {transform_indices = @transform_2, window_bounds = array<i64: 1, 8, 128>}]} {
    %c0_i32 = arith.constant 0 : i32
    %0 = arith.cmpi eq, %arg1, %c0_i32 : i32
    %1 = arith.extui %0 : i1 to i32
    %c0_i32_0 = arith.constant 0 : i32
    %2 = arith.cmpi ne, %1, %c0_i32_0 : i32
    scf.if %2 {
      %cst_12 = arith.constant 0.000000e+00 : f32
      %19 = vector.broadcast %cst_12 : f32 to vector<1x8x128xf32>
      %c0_13 = arith.constant 0 : index
      %c0_14 = arith.constant 0 : index
      %c0_15 = arith.constant 0 : index
      %20 = vector.load %arg4[%c0_13, %c0_14, %c0_15] : memref<1x8x128xf32, #tpu.memory_space<vmem>>, vector<1x8x128xf32>
      tpu.vector_store %arg4[%c0_13, %c0_14, %c0_15], %19 {strides = array<i32>} : memref<1x8x128xf32, #tpu.memory_space<vmem>>, vector<1x8x128xf32>,
    } else {
    }
    %c0 = arith.constant 0 : index
    %c0_1 = arith.constant 0 : index
    %3 = vector.load %arg2[%c0, %c0_1] : memref<8x256xf32, #tpu.memory_space<vmem>>, vector<8x256xf32>
    %c0_2 = arith.constant 0 : index
    %c0_3 = arith.constant 0 : index
    %4 = vector.load %arg3[%c0_2, %c0_3] : memref<8x256xf32, #tpu.memory_space<vmem>>, vector<8x256xf32>
    %5 = arith.subf %3, %4 : vector<8x256xf32>
    %6 = arith.mulf %5, %5 : vector<8x256xf32>
    %7 = vector.shape_cast %6 : vector<8x256xf32> to vector<1x8x256xf32>
    %cst = arith.constant dense<0.000000e+00> : vector<8x256xf32>
    %8 = vector.multi_reduction <add>, %7, %cst [0] : vector<1x8x256xf32> to vector<8x256xf32>
    %9 = vector.extract_strided_slice %8 {offsets = [0, 0], sizes = [8, 128], strides = [1, 1]} : vector<8x256xf32> to vector<8x128xf32>
    %10 = vector.extract_strided_slice %8 {offsets = [0, 128], sizes = [8, 128], strides = [1, 1]} : vector<8x256xf32> to vector<8x128xf32>
    %11 = arith.addf %9, %10 : vector<8x128xf32>
    %c0_4 = arith.constant 0 : index
    %c0_5 = arith.constant 0 : index
    %c0_6 = arith.constant 0 : index
    %12 = vector.load %arg4[%c0_4, %c0_5, %c0_6] : memref<1x8x128xf32, #tpu.memory_space<vmem>>, vector<1x8x128xf32>
    %13 = vector.shape_cast %11 : vector<8x128xf32> to vector<1x8x128xf32>
    %14 = arith.addf %12, %13 : vector<1x8x128xf32>
    %c0_7 = arith.constant 0 : index
    %c0_8 = arith.constant 0 : index
    %c0_9 = arith.constant 0 : index
    %15 = vector.load %arg4[%c0_7, %c0_8, %c0_9] : memref<1x8x128xf32, #tpu.memory_space<vmem>>, vector<1x8x128xf32>
    tpu.vector_store %arg4[%c0_7, %c0_8, %c0_9], %14 {strides = array<i32>} : memref<1x8x128xf32, #tpu.memory_space<vmem>>, vector<1x8x128xf32>,
    %c0_i32_10 = arith.constant 0 : i32
    %16 = arith.cmpi eq, %arg1, %c0_i32_10 : i32
    %17 = arith.extui %16 : i1 to i32
    %c0_i32_11 = arith.constant 0 : i32
    %18 = arith.cmpi ne, %17, %c0_i32_11 : i32
    scf.if %18 {
      %c0_12 = arith.constant 0 : index
      %c0_13 = arith.constant 0 : index
      %c0_14 = arith.constant 0 : index
      %19 = vector.load %arg4[%c0_12, %c0_13, %c0_14] : memref<1x8x128xf32, #tpu.memory_space<vmem>>, vector<1x8x128xf32>
      %cst_15 = arith.constant 2.44140625E-4 : f32
      %20 = vector.broadcast %cst_15 : f32 to vector<1x8x128xf32>
      %21 = arith.mulf %19, %20 : vector<1x8x128xf32>
      %c0_16 = arith.constant 0 : index
      %c0_17 = arith.constant 0 : index
      %c0_18 = arith.constant 0 : index
      %22 = vector.load %arg4[%c0_16, %c0_17, %c0_18] : memref<1x8x128xf32, #tpu.memory_space<vmem>>, vector<1x8x128xf32>
      tpu.vector_store %arg4[%c0_16, %c0_17, %c0_18], %21 {strides = array<i32>} : memref<1x8x128xf32, #tpu.memory_space<vmem>>, vector<1x8x128xf32>,
    } else {
    }
    return
  }
  func.func @transform_0(%arg0: i32, %arg1: i32) -> (i32, i32) {
    %c0_i32 = arith.constant 0 : i32
    return %arg0, %arg1 : i32, i32
  }
  func.func @transform_1(%arg0: i32, %arg1: i32) -> (i32, i32) {
    %c0_i32 = arith.constant 0 : i32
    return %arg0, %arg1 : i32, i32
  }
  func.func @transform_2(%arg0: i32, %arg1: i32) -> (i32, i32, i32) {
    %c0_i32 = arith.constant 0 : i32
    %c0_i32_0 = arith.constant 0 : i32
    %c0_i32_1 = arith.constant 0 : i32
    return %arg0, %c0_i32, %c0_i32_0 : i32, i32, i32
  }
}

</mosaic_0001>

<bundles_post_ra>
// kernel: tpu_custom_call.1
= control target key start
LH: loop header
LB: loop body
LE: loop exit
PB: predicated region body
PF: predicated region fallthrough
CT: control target
= control target key end

     0   :  { %7 = vsyncpa [#allocation3], 0  ;;  %s207_s0 = inlined_call_operand.hbm [shape: f32[8,256], index: 0, kind: input, shape index: {}]   ;;  %s208_s1 = inlined_call_operand.hbm [shape: f32[8,256], index: 1, kind: input, shape index: {}]   ;;  %s209_s2 = inlined_call_operand.hbm [shape: f32[1,8,128], index: 2, kind: output, shape index: {}]  }
   0x1   :  { %8 = vsyncpa [#allocation6], 0 }
   0x2   :  { %9 = vsyncpa [#allocation4], 0  ;;  %s153_s9 = smov [#allocation2]   ;;  %s154_s11 = smov [#allocation5]  }
   0x3   :  { %s16_s10 = sshll.u32 %s153_s9, 4  ;;  %s26_s12 = sshll.u32 %s154_s11, 4  ;;  %s17_s10 = int_to_ptr.vmem [resolvable:$true] %s16_s10  ;;  %s27_s12 = int_to_ptr.vmem [resolvable:$true] %s26_s12 }
   0x4   :  { %s81_s15 = scalar_lea.hbm %s207_s0, 256 }
   0x5   :  { %p82_p0 = scmp.ne.s32.totalorder %s207_s0, %s81_s15  ;;  %p85_p1 = scmp.lt.u32.totalorder %s81_s15, %s207_s0 }
   0x7   :  { %p87_p2 = pnand %p85_p1, %p82_p0 }
   0x9   :  { %90 = shalt.err (!%p87_p2)
}
   0xa   :  { %s91_s20 = scalar_lea.vmem %s17_s10, 256  ;;  %p96_p4 = scmp.lt.s32.totalorder %s17_s10, %s17_s10 }
   0xb   :  { %p92_p3 = scmp.ne.s32.totalorder %s17_s10, %s91_s20  ;;  %p97_p5 = scmp.lt.s32.totalorder %s91_s20, %s91_s20 }
   0xd   :  { %p98_p6 = por %p97_p5, %p96_p4 }
   0xf   :  { %p99_p7 = pnand %p98_p6, %p92_p3 }
  0x11   :  { %102 = shalt.err (!%p99_p7)
}
  0x12   :  { %19 = dma.hbm_to_vmem [thread:$0]  %s207_s0, 256, %s17_s10, [#allocation3]  }
  0x13   :  { %s103_s25 = scalar_lea.hbm %s208_s1, 256 }
  0x14   :  { %p104_p8 = scmp.ne.s32.totalorder %s208_s1, %s103_s25  ;;  %p107_p9 = scmp.lt.u32.totalorder %s103_s25, %s208_s1 }
  0x16   :  { %p109_p10 = pnand %p107_p9, %p104_p8 }
  0x18   :  { %112 = shalt.err (!%p109_p10)
}
  0x19   :  { %s113_s30 = scalar_lea.vmem %s27_s12, 256  ;;  %p118_p12 = scmp.lt.s32.totalorder %s27_s12, %s27_s12 }
  0x1a   :  { %p114_p11 = scmp.ne.s32.totalorder %s27_s12, %s113_s30  ;;  %p119_p13 = scmp.lt.s32.totalorder %s113_s30, %s113_s30 }
  0x1c   :  { %p120_p0 = por %p119_p13, %p118_p12 }
  0x1e   :  { %p121_p1 = pnand %p120_p0, %p114_p11 }
  0x20   :  { %124 = shalt.err (!%p121_p1)
}
  0x21   :  { %29 = dma.hbm_to_vmem [thread:$0]  %s208_s1, 256, %s27_s12, [#allocation6]  }
  0x22   :  { %147 = dma.done.wait [#allocation3], 256  }
  0x23   :  { %148 = vsyncadd [#allocation3], 4294967040 }
  0x24   :  { %149 = dma.done.wait [#allocation6], 256  }
  0x25   :  { %150 = vsyncadd [#allocation6], 4294967040  ;;  %v41_v0 = vld [vmem:[#allocation2] sm:$0xff]  ;;  %v42_v1 = vld [vmem:[#allocation2 + $0x8] sm:$0xff]  ;;  %s155_s4 = smov [#allocation7]  }
  0x26   :  { %v43_v2 = vld [vmem:[#allocation5] sm:$0xff]  ;;  %v44_v3 = vld [vmem:[#allocation5 + $0x8] sm:$0xff]  ;;  %s67_s5 = sshll.u32 %s155_s4, 4  ;;  %s68_s5 = int_to_ptr.vmem [resolvable:$true] %s67_s5 }
  0x27   :  { %v45_v4 = vsub.f32 %v41_v0, %v43_v2  ;;  %v46_v5 = vsub.f32 %v42_v1, %v44_v3  ;;  %s125_s6 = scalar_lea.vmem %s68_s5, 128  ;;  %p130_p3 = scmp.lt.s32.totalorder %s68_s5, %s68_s5 }
  0x28   :  { %p126_p2 = scmp.ne.s32.totalorder %s68_s5, %s125_s6  ;;  %p131_p4 = scmp.lt.s32.totalorder %s125_s6, %s125_s6 }
  0x29   :  { %v47_v6 = vmul.f32 %v45_v4, %v45_v4  ;;  %v48_v7 = vmul.f32 %v46_v5, %v46_v5 }
  0x2a   :  { %p132_p5 = por %p131_p4, %p130_p3 }
  0x2b   :  { %v51_v8 = vadd.f32 %v48_v7, %v47_v6 }
  0x2c   :  { %p133_p6 = pnand %p132_p5, %p126_p2 }
  0x2d   :  { %v59_v9 = vmul.f32 0.00024414063, %v51_v8 }
  0x2f   :  { %60 = vst [vmem:[#allocation7] sm:$0xff] %v59_v9 }
  0x30   :  { %136 = shalt.err (!%p133_p6)
}
  0x31   :  { %s137_s8 = scalar_lea.hbm %s209_s2, 128 }
  0x32   :  { %p138_p7 = scmp.ne.s32.totalorder %s209_s2, %s137_s8  ;;  %p141_p8 = scmp.lt.u32.totalorder %s137_s8, %s209_s2 }
  0x34   :  { %p143_p9 = pnand %p141_p8, %p138_p7 }
  0x36   :  { %146 = shalt.err (!%p143_p9)
}
  0x37   :  { %70 = dma.vmem_to_hbm [thread:$0]  %s68_s5, 128, %s209_s2, [#allocation4]  }
  0x38   :  { %151 = dma.done.wait [#allocation4], 128  }
  0x39   :  { %152 = vsyncadd [#allocation4], 4294967168 }
  0x3a   :  { %74 = vsyncpa [#allocation3], 1 }
  0x3b   :  { %75 = vsyncpa [#allocation6], 1 }
  0x3c   :  { %76 = vsyncpa [#allocation4], 1 }

</bundles_post_ra>
